<compile_context>
chip_gen: v7x
topology: tpu7x:2x2x1
jax: 0.10.0
libtpu: 0.0.40
codegen_flags: <defaults>
</compile_context>

<pallas_src>
import functools

import jax
import jax.numpy as jnp
from jax.experimental import pallas as pl
from jax.experimental.pallas import tpu as pltpu

BN_EPS = 1e-5
_LANE = 128                      # channel padding granularity (lane width)
_POINTWISE_TILE_M = 512          # row tile for flattened 1x1-conv matmuls
_SPATIAL_ACC_BYTES = 128 * 1024  # target size of the f32 conv accumulator tile


def _round_up(a, b):
    return (a + b - 1) // b * b


_PHYS_VMEM = None


def _phys_vmem_bytes():
    global _PHYS_VMEM
    if _PHYS_VMEM is None:
        try:
            _PHYS_VMEM = int(pltpu.get_tpu_info().vmem_capacity_bytes)
        except Exception:
            _PHYS_VMEM = 128 << 20
    return _PHYS_VMEM


def _mosaic_params(dim_semantics, vmem_bytes_est):
    # Cap the scoped-VMEM limit at ~half of physical VMEM (≈32 MiB on v7x,
    # ≈64 MiB on v5e/v6e) and never below a 16 MiB floor.
    cap = max(_phys_vmem_bytes() // 2, 16 << 20)
    vmem = int(min(max(2 * vmem_bytes_est + (2 << 20), 16 << 20), cap))
    return pltpu.CompilerParams(dimension_semantics=dim_semantics,
                                vmem_limit_bytes=vmem)


# ----------------------------------------------------------------------------
# Pallas kernels
# ----------------------------------------------------------------------------
def _pointwise_kernel(x_ref, w_ref, s_ref, b_ref, *rest, relu, has_skip):
    # x: (TILE_M, Cin), w: (Cin, Cout), s/b: (1, Cout), [skip: (TILE_M, Cout)],
    # o: (TILE_M, Cout).  Matmul accumulates in f32; epilogue in f32.
    if has_skip:
        skip_ref, o_ref = rest
    else:
        (o_ref,) = rest
        skip_ref = None
    acc = jnp.dot(x_ref[...], w_ref[...], preferred_element_type=jnp.float32)
    out = acc * s_ref[...] + b_ref[...]
    if has_skip:
        out = out + skip_ref[...].astype(jnp.float32)   # fused residual add
    if relu:
        out = jnp.maximum(out, 0.0)
    o_ref[...] = out.astype(o_ref.dtype)


def _conv_kxk_kernel(xm_ref, xh_ref, w_ref, s_ref, b_ref, o_ref, xscr_ref,
                     *, k, stride, relu, th, halo, wo, n_qx):
    # xm_ref:   (1, s*s, th, Wq, Cin)     main phase rows of this (n, row-tile)
    # xh_ref:   (1, s*s, halo, Wq, Cin)   halo phase rows (the next `halo` rows)
    # w_ref:    (k, k, Cin, Cout); s/b: (1, Cout); o_ref: (1, th, Wo, Cout)
    # xscr_ref: (n_qx, s*s, th+halo, Wq, Cin) VMEM scratch; plane j holds the
    #           contiguous (main+halo) rows shifted left by j columns so every
    #           tap slice is a contiguous, layout-preserving view (Wq % 8 == 0).
    s = stride
    Wq, Cin = xm_ref.shape[-2], xm_ref.shape[-1]
    Cout = o_ref.shape[-1]

    # Assemble the scratch once per grid step (replaces per-tap repacks).
    xscr_ref[0, :, :th] = xm_ref[0]
    xscr_ref[0, :, th:] = xh_ref[0]
    for j in range(1, n_qx):
        xscr_ref[j, :, :th, :Wq - j, :] = xm_ref[0, :, :, j:, :]
        xscr_ref[j, :, th:, :Wq - j, :] = xh_ref[0, :, :, j:, :]

    # Register accumulation: one f32 local value, written to o_ref once.
    acc = jnp.zeros((th * Wq, Cout), jnp.float32)
    for dy in range(k):
        for dx in range(k):
            p = (dy % s) * s + (dx % s)
            qy, qx = dy // s, dx // s
            slab = xscr_ref[qx, p, qy:qy + th, :, :]           # (th, Wq, Cin)
            acc = acc + jnp.dot(slab.reshape(th * Wq, Cin), w_ref[dy, dx],
                                preferred_element_type=jnp.float32)

    out = acc * s_ref[...] + b_ref[...]
    if relu:
        out = jnp.maximum(out, 0.0)
    out = out.reshape(th, Wq, Cout)[:, :wo, :]
    o_ref[...] = out.reshape(1, th, wo, Cout).astype(o_ref.dtype)


# ----------------------------------------------------------------------------
# Pallas wrappers
# ----------------------------------------------------------------------------
def pointwise_conv_bn(x_nhwc, w_io, scale, bias, *, relu, out_dtype, skip_nhwc=None):
    """1x1 conv + folded BN(+mask) [+ fused residual add] [+ ReLU].

    Row-tiled over M = N*H*W (channels are lane-dense, padded to 128).
    """
    N, H, W, Cin = x_nhwc.shape
    Cout = w_io.shape[1]
    M = N * H * W
    x2 = x_nhwc.reshape(M, Cin)
    # Small M -> single full block (always legal); otherwise stream 512-row
    # tiles (partial last tile handled by Pallas store masking).
    tile_m = M if M <= _POINTWISE_TILE_M else _POINTWISE_TILE_M
    grid = (pl.cdiv(M, tile_m),)

    in_specs = [
        pl.BlockSpec((tile_m, Cin), lambda i: (i, 0)),
        pl.BlockSpec((Cin, Cout), lambda i: (0, 0)),
        pl.BlockSpec((1, Cout), lambda i: (0, 0)),
        pl.BlockSpec((1, Cout), lambda i: (0, 0)),
    ]
    args = [x2, w_io, scale.reshape(1, Cout), bias.reshape(1, Cout)]
    has_skip = skip_nhwc is not None
    if has_skip:
        assert skip_nhwc.shape[:3] == x_nhwc.shape[:3]
        in_specs.append(pl.BlockSpec((tile_m, Cout), lambda i: (i, 0)))
        args.append(skip_nhwc.reshape(M, Cout))

    isz = x2.dtype.itemsize
    osz = jnp.dtype(out_dtype).itemsize
    est = (tile_m * Cin * isz + tile_m * Cout * osz + Cin * Cout * isz
           + 2 * Cout * 4)
    if has_skip:
        est += tile_m * Cout * args[-1].dtype.itemsize

    out = pl.pallas_call(
        functools.partial(_pointwise_kernel, relu=relu, has_skip=has_skip),
        out_shape=jax.ShapeDtypeStruct((M, Cout), out_dtype),
        grid=grid,
        in_specs=in_specs,
        out_specs=pl.BlockSpec((tile_m, Cout), lambda i: (i, 0)),
        compiler_params=_mosaic_params(("parallel",), est),
    )(*args)
    return out.reshape(N, H, W, Cout)


def _pick_th(ho, halo_blk, desired):
    # Row tile: multiple of halo_blk; prefer an exact divisor of Ho so the
    # output needs no padded-H slice afterwards.
    desired = max(halo_blk, min(desired, _round_up(ho, halo_blk)))
    desired -= desired % halo_blk
    for cand in range(desired, halo_blk - 1, -halo_blk):
        if ho % cand == 0:
            return cand
    return max(desired, halo_blk)


def spatial_conv_bn(x_nhwc, w_hwio, scale, bias, *, stride, pad, relu, out_dtype):
    """kxk conv (any stride) + folded BN(+mask) [+ ReLU].

    Space-to-batch stride phases + (N, Ho-tile) grid.  Halo rows arrive via a
    second BlockSpec on the same array; the kernel accumulates in registers.
    """
    N, H, W, Cin = x_nhwc.shape
    k = w_hwio.shape[0]
    Cout = w_hwio.shape[3]
    s = stride
    Ho = (H + 2 * pad - k) // s + 1
    Wo = (W + 2 * pad - k) // s + 1
    halo = (k - 1) // s                 # extra phase rows/cols beyond a tile
    halo_blk = max(halo, 1)
    n_qx = halo + 1                     # distinct column shifts (phase coords)

    # Wq is a multiple of 8 so flattening (th, Wq, Cin)->(th*Wq, Cin) is a view.
    Wq = _round_up(max(Wo + halo, pl.cdiv(W + 2 * pad, s)), 8)
    th = _pick_th(Ho, halo_blk, max(1, _SPATIAL_ACC_BYTES // (Wq * Cout * 4)))
    ho_pad = _round_up(Ho, th)
    n_t = ho_pad // th
    Hq = max(n_t * th + halo_blk, pl.cdiv(H + 2 * pad, s))
    Hp, Wp = s * Hq, s * Wq

    # TODO(synk): fold this pad + space-to-batch into the kernel (manual DMA)
    # to remove the extra HBM pass over op2's input.
    xp = jnp.pad(x_nhwc, ((0, 0), (pad, Hp - H - pad), (pad, Wp - W - pad), (0, 0)))
    # x_sb[n, ry*s+rx, hq, wq, c] = xp[n, s*hq+ry, s*wq+rx, c]
    x_sb = (xp.reshape(N, Hq, s, Wq, s, Cin)
              .transpose(0, 2, 4, 1, 3, 5)
              .reshape(N, s * s, Hq, Wq, Cin))

    isz = x_sb.dtype.itemsize
    osz = jnp.dtype(out_dtype).itemsize
    est = (s * s * (th + halo_blk) * Wq * Cin * isz * (1 + n_qx)
           + k * k * Cin * Cout * isz
           + th * Wo * Cout * osz
           + th * Wq * Cout * 4
           + 2 * Cout * 4)

    ratio = th // halo_blk  # halo block index multiplier (exact by construction)
    out = pl.pallas_call(
        functools.partial(_conv_kxk_kernel, k=k, stride=s, relu=relu,
                          th=th, halo=halo_blk, wo=Wo, n_qx=n_qx),
        out_shape=jax.ShapeDtypeStruct((N, ho_pad, Wo, Cout), out_dtype),
        grid=(N, n_t),
        in_specs=[
            pl.BlockSpec((1, s * s, th, Wq, Cin), lambda n, t: (n, 0, t, 0, 0)),
            pl.BlockSpec((1, s * s, halo_blk, Wq, Cin),
                         lambda n, t: (n, 0, (t + 1) * ratio, 0, 0)),
            pl.BlockSpec((k, k, Cin, Cout), lambda n, t: (0, 0, 0, 0)),
            pl.BlockSpec((1, Cout), lambda n, t: (0, 0)),
            pl.BlockSpec((1, Cout), lambda n, t: (0, 0)),
        ],
        out_specs=pl.BlockSpec((1, th, Wo, Cout), lambda n, t: (n, t, 0, 0)),
        scratch_shapes=[pltpu.VMEM((n_qx, s * s, th + halo_blk, Wq, Cin),
                                   x_sb.dtype)],
        compiler_params=_mosaic_params(("parallel", "parallel"), est),
    )(x_sb, x_sb, w_hwio, scale.reshape(1, Cout), bias.reshape(1, Cout))
    if ho_pad != Ho:
        out = out[:, :Ho]
    return out


# ----------------------------------------------------------------------------
# Module logic (glue + parameter folding)
# ----------------------------------------------------------------------------
def fold_bn(gamma, beta, mean, var, mask):
    inv_std = 1.0 / jnp.sqrt(var + BN_EPS)
    scale = gamma * inv_std * mask
    bias = (beta - mean * gamma * inv_std) * mask
    return scale, bias


def masked_conv_bn_relu_pallas(x_nhwc, p, stride, relu, act_dtype, skip=None):
    # `relu` here means: ReLU applied AFTER the (optional) fused residual add.
    # x_nhwc arrives with channels already padded to a multiple of 128; the
    # weight/scale/bias are zero-padded to match, so padded channels stay zero.
    scale, bias = fold_bn(p["gamma"], p["beta"], p["mean"], p["var"], p["mask"])
    k, _, cin, cout = p["w"].shape
    cin_p = x_nhwc.shape[-1]
    assert cin_p >= cin and cin_p % _LANE == 0
    cout_p = _round_up(cout, _LANE)
    w = jnp.pad(p["w"], ((0, 0), (0, 0), (0, cin_p - cin), (0, cout_p - cout)))
    w = w.astype(act_dtype)
    scale = jnp.pad(scale, (0, cout_p - cout))
    bias = jnp.pad(bias, (0, cout_p - cout))

    if k == 1:
        if stride > 1:
            # 1x1 conv, pad 0: strided conv == pointwise conv on subsampled input.
            # TODO(synk): fold this subsample into the BlockSpec index_map to
            # avoid the extra HBM pass over x (skip-conv path).
            x_nhwc = x_nhwc[:, ::stride, ::stride, :]
        return pointwise_conv_bn(x_nhwc, w[0, 0], scale, bias,
                                 relu=relu, out_dtype=act_dtype, skip_nhwc=skip)
    assert skip is None
    pad = (k - 1) // 2
    return spatial_conv_bn(x_nhwc, w, scale, bias,
                           stride=stride, pad=pad, relu=relu, out_dtype=act_dtype)


def masked_bottleneck_block_nhwc(x_nhwc, params, stride, act_dtype=jnp.float32,
                                 keep_padded_channels=False):
    """NHWC entry point (use this when stacking blocks to avoid transposes)."""
    cin = x_nhwc.shape[-1]
    cin_p = _round_up(cin, _LANE)
    x = x_nhwc.astype(act_dtype)
    if cin_p != cin:
        x = jnp.pad(x, ((0, 0), (0, 0), (0, 0), (0, cin_p - cin)))

    out = masked_conv_bn_relu_pallas(x, params["op1"], 1, True, act_dtype)
    out = masked_conv_bn_relu_pallas(out, params["op2"], stride, True, act_dtype)
    if params["skip"] is not None:
        skip = masked_conv_bn_relu_pallas(x, params["skip"], stride, False, act_dtype)
    else:
        skip = x
    # op3 (no own ReLU) with residual add + final ReLU fused into its epilogue.
    out = masked_conv_bn_relu_pallas(out, params["op3"], 1, True, act_dtype, skip=skip)

    if not keep_padded_channels:
        cout = params["op3"]["w"].shape[3]
        if out.shape[-1] != cout:
            out = out[..., :cout]
    return out


def masked_bottleneck_block_pallas(x_nchw, params, stride, act_dtype=jnp.float32):
    # NCHW boundary wrapper (PyTorch layout).  When stacking blocks, prefer
    # masked_bottleneck_block_nhwc to keep activations NHWC across blocks.
    x = jnp.transpose(x_nchw, (0, 2, 3, 1))
    out = masked_bottleneck_block_nhwc(x, params, stride, act_dtype)
    return jnp.transpose(out, (0, 3, 1, 2))


# ----------------------------------------------------------------------------
# Pure-JAX reference (for correctness check)
# ----------------------------------------------------------------------------
def ref_masked_conv_bn_relu(x_nhwc, p, stride, relu):
    scale, bias = fold_bn(p["gamma"], p["beta"], p["mean"], p["var"], p["mask"])
    k = p["w"].shape[0]
    pad = (k - 1) // 2 if k > 1 else 0
    out = jax.lax.conv_general_dilated(
        x_nhwc, p["w"], window_strides=(stride, stride),
        padding=[(pad, pad), (pad, pad)],
        dimension_numbers=("NHWC", "HWIO", "NHWC"))
    out = out * scale.reshape(1, 1, 1, -1) + bias.reshape(1, 1, 1, -1)
    if relu:
        out = jnp.maximum(out, 0.0)
    return out


def ref_masked_bottleneck_block(x_nchw, params, stride):
    x = jnp.transpose(x_nchw, (0, 2, 3, 1))
    out = ref_masked_conv_bn_relu(x, params["op1"], 1, True)
    out = ref_masked_conv_bn_relu(out, params["op2"], stride, True)
    out = ref_masked_conv_bn_relu(out, params["op3"], 1, False)
    skip = (ref_masked_conv_bn_relu(x, params["skip"], stride, False)
            if params["skip"] is not None else x)
    out = jnp.maximum(out + skip, 0.0)
    return jnp.transpose(out, (0, 3, 1, 2))


# ----------------------------------------------------------------------------
# Deterministic parameter init (synthetic; shapes follow the module __init__)
# ----------------------------------------------------------------------------
def init_op_params(key, c_in, c_out, k):
    ks = jax.random.split(key, 5)
    return dict(
        w=jax.random.normal(ks[0], (k, k, c_in, c_out), jnp.float32) * 0.1,  # HWIO
        gamma=1.0 + 0.1 * jax.random.normal(ks[1], (c_out,), jnp.float32),
        beta=0.1 * jax.random.normal(ks[2], (c_out,), jnp.float32),
        mean=0.1 * jax.random.normal(ks[3], (c_out,), jnp.float32),
        var=jax.random.uniform(ks[4], (c_out,), jnp.float32, minval=0.5, maxval=1.5),
        mask=jnp.ones((c_out,), jnp.float32),  # module buffer init: ones
    )


def init_block_params(key, c_in, c_out, stride, kernel_size, expansion=4):
    k1, k2, k3, k4 = jax.random.split(key, 4)
    params = dict(
        op1=init_op_params(k1, c_in, c_out, 1),
        op2=init_op_params(k2, c_out, c_out, kernel_size),
        op3=init_op_params(k3, c_out, c_out * expansion, 1),
    )
    is_skip_conv = not (stride == 1 and c_in == c_out * expansion)
    params["skip"] = (init_op_params(k4, c_in, c_out * expansion, 1)
                      if is_skip_conv else None)
    return params


# ----------------------------------------------------------------------------
if __name__ == "__main__":
    key = jax.random.PRNGKey(0)
    k_x, k_p, k_x2, k_p2 = jax.random.split(key, 4)

    # --- Config 1: stride-2 block with conv skip (downsampling bottleneck) ---
    N, C_IN, H, W = 2, 4, 16, 16
    C_OUT, STRIDE, KERNEL_SIZE, EXPANSION = 4, 2, 3, 4
    x = jax.random.normal(k_x, (N, C_IN, H, W), jnp.float32)
    params = init_block_params(k_p, C_IN, C_OUT, STRIDE, KERNEL_SIZE, EXPANSION)

    ref = jax.block_until_ready(ref_masked_bottleneck_block(x, params, STRIDE))

    out_f32 = jax.block_until_ready(
        masked_bottleneck_block_pallas(x, params, STRIDE, jnp.float32))
    H_OUT = (H + 2 * ((KERNEL_SIZE - 1) // 2) - KERNEL_SIZE) // STRIDE + 1
    assert out_f32.shape == (N, C_OUT * EXPANSION, H_OUT, H_OUT), out_f32.shape
    assert jnp.allclose(out_f32, ref, atol=1e-4, rtol=1e-4), \
        float(jnp.max(jnp.abs(out_f32 - ref)))

    # bf16 activation path (f32 accumulation): looser tolerance vs f32 reference
    out_bf16 = jax.block_until_ready(
        masked_bottleneck_block_pallas(x, params, STRIDE, jnp.bfloat16))
    assert jnp.allclose(out_bf16.astype(jnp.float32), ref, atol=5e-2, rtol=5e-2), \
        float(jnp.max(jnp.abs(out_bf16.astype(jnp.float32) - ref)))

    # --- Config 2: stride-1 block with identity skip (fused identity add) ---
    N2, C_IN2, H2, W2 = 2, 16, 8, 8
    C_OUT2, STRIDE2 = 4, 1
    x2 = jax.random.normal(k_x2, (N2, C_IN2, H2, W2), jnp.float32)
    params2 = init_block_params(k_p2, C_IN2, C_OUT2, STRIDE2, KERNEL_SIZE, EXPANSION)
    assert params2["skip"] is None  # identity skip path

    ref2 = jax.block_until_ready(ref_masked_bottleneck_block(x2, params2, STRIDE2))
    out2 = jax.block_until_ready(
        masked_bottleneck_block_pallas(x2, params2, STRIDE2, jnp.float32))
    assert out2.shape == (N2, C_OUT2 * EXPANSION, H2, W2), out2.shape
    assert jnp.allclose(out2, ref2, atol=1e-4, rtol=1e-4), \
        float(jnp.max(jnp.abs(out2 - ref2)))

    print("KERNEL_OK")
</pallas_src>

<mosaic_0001>
module attributes {stable_mosaic.version = 11 : i64} {
  func.func @_pointwise_kernel(%arg0: i32, %arg1: memref<512x128xf32, #tpu.memory_space<vmem>>, %arg2: memref<128x128xf32, #tpu.memory_space<vmem>>, %arg3: memref<1x128xf32, #tpu.memory_space<vmem>>, %arg4: memref<1x128xf32, #tpu.memory_space<vmem>>, %arg5: memref<512x128xf32, #tpu.memory_space<vmem>>) attributes {dimension_semantics = [#tpu.dimension_semantics<parallel>], iteration_bounds = array<i64: 1>, scalar_prefetch = 0 : i64, scratch_operands = 0 : i64, tpu.core_type = #tpu.core_type<tc>, window_params = [{transform_indices = @transform_0, window_bounds = array<i64: 512, 128>}, {pipeline_mode = #tpu.pipeline_mode<synchronous>, transform_indices = @transform_1, window_bounds = array<i64: 128, 128>}, {pipeline_mode = #tpu.pipeline_mode<synchronous>, transform_indices = @transform_2, window_bounds = array<i64: 1, 128>}, {pipeline_mode = #tpu.pipeline_mode<synchronous>, transform_indices = @transform_3, window_bounds = array<i64: 1, 128>}, {transform_indices = @transform_4, window_bounds = array<i64: 512, 128>}]} {
    %c0 = arith.constant 0 : index
    %c0_0 = arith.constant 0 : index
    %0 = vector.load %arg1[%c0, %c0_0] : memref<512x128xf32, #tpu.memory_space<vmem>>, vector<512x128xf32>
    %c0_1 = arith.constant 0 : index
    %c0_2 = arith.constant 0 : index
    %1 = vector.load %arg2[%c0_1, %c0_2] : memref<128x128xf32, #tpu.memory_space<vmem>>, vector<128x128xf32>
    %cst = arith.constant dense<0.000000e+00> : vector<512x128xf32>
    %2 = tpu.matmul %0, %1, %cst {dimension_numbers = #tpu.dot_dimension_numbers<[1], [0], [0], [1], [0, 0, 1, 1], [], []>} : vector<512x128xf32>, vector<128x128xf32>, vector<512x128xf32> -> vector<512x128xf32>
    %c0_3 = arith.constant 0 : index
    %c0_4 = arith.constant 0 : index
    %3 = vector.load %arg3[%c0_3, %c0_4] : memref<1x128xf32, #tpu.memory_space<vmem>>, vector<1x128xf32>
    %4 = vector.broadcast %3 : vector<1x128xf32> to vector<512x128xf32>
    %5 = arith.mulf %2, %4 : vector<512x128xf32>
    %c0_5 = arith.constant 0 : index
    %c0_6 = arith.constant 0 : index
    %6 = vector.load %arg4[%c0_5, %c0_6] : memref<1x128xf32, #tpu.memory_space<vmem>>, vector<1x128xf32>
    %7 = vector.broadcast %6 : vector<1x128xf32> to vector<512x128xf32>
    %8 = arith.addf %5, %7 : vector<512x128xf32>
    %cst_7 = arith.constant 0.000000e+00 : f32
    %9 = vector.broadcast %cst_7 : f32 to vector<512x128xf32>
    %10 = arith.maximumf %8, %9 : vector<512x128xf32>
    %c0_8 = arith.constant 0 : index
    %c0_9 = arith.constant 0 : index
    %11 = vector.load %arg5[%c0_8, %c0_9] : memref<512x128xf32, #tpu.memory_space<vmem>>, vector<512x128xf32>
    tpu.vector_store %arg5[%c0_8, %c0_9], %10 {strides = array<i32>} : memref<512x128xf32, #tpu.memory_space<vmem>>, vector<512x128xf32>,
    return
  }
  func.func @transform_0(%arg0: i32) -> (i32, i32) {
    %c0_i32 = arith.constant 0 : i32
    %c0_i32_0 = arith.constant 0 : i32
    return %arg0, %c0_i32 : i32, i32
  }
  func.func @transform_1(%arg0: i32) -> (i32, i32) {
    %c0_i32 = arith.constant 0 : i32
    %c0_i32_0 = arith.constant 0 : i32
    %c0_i32_1 = arith.constant 0 : i32
    return %c0_i32, %c0_i32_0 : i32, i32
  }
  func.func @transform_2(%arg0: i32) -> (i32, i32) {
    %c0_i32 = arith.constant 0 : i32
    %c0_i32_0 = arith.constant 0 : i32
    %c0_i32_1 = arith.constant 0 : i32
    return %c0_i32, %c0_i32_0 : i32, i32
  }
  func.func @transform_3(%arg0: i32) -> (i32, i32) {
    %c0_i32 = arith.constant 0 : i32
    %c0_i32_0 = arith.constant 0 : i32
    %c0_i32_1 = arith.constant 0 : i32
    return %c0_i32, %c0_i32_0 : i32, i32
  }
  func.func @transform_4(%arg0: i32) -> (i32, i32) {
    %c0_i32 = arith.constant 0 : i32
    %c0_i32_0 = arith.constant 0 : i32
    return %arg0, %c0_i32 : i32, i32
  }
}

</mosaic_0001>

<bundles_post_ra>
// kernel: tpu_custom_call.1
= control target key start
LH: loop header
LB: loop body
LE: loop exit
PB: predicated region body
PF: predicated region fallthrough
CT: control target
= control target key end

     0   :  { %9 = vsyncpa [#allocation3], 0  ;;  %s1347_s0 = inlined_call_operand.hbm [shape: f32[512,128], index: 0, kind: input, shape index: {}]   ;;  %s1348_s1 = inlined_call_operand.hbm [shape: f32[128,128], index: 1, kind: input, shape index: {}]   ;;  %s1349_s2 = inlined_call_operand.vmem [shape: f32[1,128], index: 2, kind: input, shape index: {}]   ;;  %s1350_s3 = inlined_call_operand.vmem [shape: f32[1,128], index: 3, kind: input, shape index: {}]   ;;  %s1351_s4 = inlined_call_operand.hbm [shape: f32[512,128], index: 4, kind: output, shape index: {}]  }
   0x1   :  { %10 = vsyncpa [#allocation6], 0 }
   0x2   :  { %11 = vsyncpa [#allocation4], 0  ;;  %s1134_s15 = smov [#allocation2]   ;;  %s1062_s19 = scalar_lea.hbm %s1347_s0, 8192 }
   0x3   :  { %s17_s16 = sshll.u32 %s1134_s15, 4  ;;  %p1063_p0 = scmp.ne.s32.totalorder %s1347_s0, %s1062_s19  ;;  %s18_s16 = int_to_ptr.vmem [resolvable:$true] %s17_s16 }
   0x4   :  { %p1066_p1 = scmp.lt.u32.totalorder %s1062_s19, %s1347_s0 }
   0x6   :  { %p1068_p2 = pnand %p1066_p1, %p1063_p0 }
   0x8   :  { %1071 = shalt.err (!%p1068_p2)
}
   0x9   :  { %s1072_s24 = scalar_lea.vmem %s18_s16, 8192  ;;  %p1077_p4 = scmp.lt.s32.totalorder %s18_s16, %s18_s16 }
   0xa   :  { %p1073_p3 = scmp.ne.s32.totalorder %s18_s16, %s1072_s24  ;;  %p1078_p5 = scmp.lt.s32.totalorder %s1072_s24, %s1072_s24 }
   0xc   :  { %p1079_p6 = por %p1078_p5, %p1077_p4 }
   0xe   :  { %p1080_p7 = pnand %p1079_p6, %p1073_p3 }
  0x10   :  { %1083 = shalt.err (!%p1080_p7)
}
  0x11   :  { %s1135_s25 = smov 128   ;;  %s1136_s26 = smov 8  }
  0x12   :  { %23 = dma.hbm_to_vmem [thread:$0]  %s1347_s0, 8192, %s18_s16, [#allocation3], %s1135_s25, %s1135_s25, %s1136_s26  }
  0x13   :  { %s1137_s29 = smov [#allocation5]   ;;  %s1084_s7 = scalar_lea.hbm %s1348_s1, 2048 }
  0x14   :  { %s29_s30 = sshll.u32 %s1137_s29, 4  ;;  %p1085_p8 = scmp.ne.s32.totalorder %s1348_s1, %s1084_s7  ;;  %s30_s30 = int_to_ptr.vmem [resolvable:$true] %s29_s30 }
  0x15   :  { %p1088_p9 = scmp.lt.u32.totalorder %s1084_s7, %s1348_s1 }
  0x17   :  { %p1090_p10 = pnand %p1088_p9, %p1085_p8 }
  0x19   :  { %1093 = shalt.err (!%p1090_p10)
}
  0x1a   :  { %s1094_s12 = scalar_lea.vmem %s30_s30, 2048  ;;  %p1099_p12 = scmp.lt.s32.totalorder %s30_s30, %s30_s30 }
  0x1b   :  { %p1095_p11 = scmp.ne.s32.totalorder %s30_s30, %s1094_s12  ;;  %p1100_p13 = scmp.lt.s32.totalorder %s1094_s12, %s1094_s12 }
  0x1d   :  { %p1101_p0 = por %p1100_p13, %p1099_p12 }
  0x1f   :  { %p1102_p1 = pnand %p1101_p0, %p1095_p11 }
  0x21   :  { %1105 = shalt.err (!%p1102_p1)
}
  0x22   :  { %35 = dma.hbm_to_vmem [thread:$0]  %s1348_s1, 2048, %s30_s30, [#allocation6], %s1135_s25, %s1135_s25, %s1136_s26  }
  0x23   :  { %1128 = dma.done.wait [#allocation3], 8192  }
  0x24   :  { %1129 = vsyncadd [#allocation3], 4294959104 }
  0x25   :  { %1130 = dma.done.wait [#allocation6], 2048  }
  0x26   :  { %1131 = vsyncadd [#allocation6], 4294965248  ;;  %v110_v0 = vld [vmem:[#allocation5] sm:$0xff]  ;;  %v111_v1 = vld [vmem:[#allocation5 + $0x8] sm:$0xff] }
  0x27   :  { %v112_v2 = vld [vmem:[#allocation5 + $0x10] sm:$0xff]  ;;  %v1009_v3 = vpack.c.bf16 %v111_v1, %v110_v0  ;;  %v113_v4 = vld [vmem:[#allocation5 + $0x18] sm:$0xff]  ;;  %v114_v6 = vld [vmem:[#allocation5 + $0x20] sm:$0xff] }
  0x28   :  { %v1013_v5 = vpack.c.bf16 %v113_v4, %v112_v2  ;;  %v115_v7 = vld [vmem:[#allocation5 + $0x28] sm:$0xff]  ;;  %v46_v9 = vld [vmem:[#allocation2] sm:$0xff]  ;;  %v116_v11 = vld [vmem:[#allocation5 + $0x30] sm:$0xff] }
  0x29   :  { %1010 = vmatprep.subr.bf16.mxu0 %v1009_v3  ;;  %1041 = vmatprep.subr.bf16.mxu1 %v1009_v3  ;;  %v1017_v8 = vpack.c.bf16 %v115_v7, %v114_v6  ;;  %v78_v10 = vld [vmem:[#allocation2 + $0x100] sm:$0xff]  ;;  %v117_v12 = vld [vmem:[#allocation5 + $0x38] sm:$0xff]  ;;  %v119_v15 = vld [vmem:[#allocation5 + $0x48] sm:$0xff] }
  0x2a   :  { %1012 = vmatpush3.bf16.msra.mxu0 %v1009_v3  ;;  %1049 = vmatpush3.bf16.msra.mxu1 %v1009_v3  ;;  %v1021_v13 = vpack.c.bf16 %v117_v12, %v116_v11  ;;  %v118_v14 = vld [vmem:[#allocation5 + $0x40] sm:$0xff]  ;;  %v120_v17 = vld [vmem:[#allocation5 + $0x50] sm:$0xff]  ;;  %v121_v18 = vld [vmem:[#allocation5 + $0x58] sm:$0xff] }
  0x2b   :  { %1014 = vmatprep.subr.bf16.mxu0 %v1013_v5  ;;  %1042 = vmatprep.subr.bf16.mxu1 %v1013_v5  ;;  %v1025_v16 = vpack.c.bf16 %v119_v15, %v118_v14  ;;  %v1029_v19 = vpack.c.bf16 %v121_v18, %v120_v17  ;;  %v122_v20 = vld [vmem:[#allocation5 + $0x60] sm:$0xff]  ;;  %v123_v21 = vld [vmem:[#allocation5 + $0x68] sm:$0xff]  ;;  %v124_v23 = vld [vmem:[#allocation5 + $0x70] sm:$0xff] }
  0x2c   :  { %913 = vmatprep.mubr.f32.mxu0 %v46_v9  ;;  %961 = vmatprep.mubr.f32.mxu1 %v78_v10  ;;  %v1033_v22 = vpack.c.bf16 %v123_v21, %v122_v20  ;;  %v125_v24 = vld [vmem:[#allocation5 + $0x78] sm:$0xff]  ;;  %v47_v26 = vld [vmem:[#allocation2 + $0x8] sm:$0xff]  ;;  %v48_v28 = vld [vmem:[#allocation2 + $0x10] sm:$0xff] }
  0x2d   :  { %v1037_v25 = vpack.c.bf16 %v125_v24, %v124_v23  ;;  %v79_v27 = vld [vmem:[#allocation2 + $0x108] sm:$0xff]  ;;  %v80_v29 = vld [vmem:[#allocation2 + $0x110] sm:$0xff]  ;;  %v49_v30 = vld [vmem:[#allocation2 + $0x18] sm:$0xff] }
  0x2e   :  { %1016 = vmatpush3.bf16.msra.mxu0 %v1013_v5  ;;  %1050 = vmatpush3.bf16.msra.mxu1 %v1013_v5  ;;  %v81_v31 = vld [vmem:[#allocation2 + $0x118] sm:$0xff]  ;;  %v50_v32 = vld [vmem:[#allocation2 + $0x20] sm:$0xff]  ;;  %v51_v34 = vld [vmem:[#allocation2 + $0x28] sm:$0xff] }
  0x2f   :  { %1018 = vmatprep.subr.bf16.mxu0 %v1017_v8  ;;  %1043 = vmatprep.subr.bf16.mxu1 %v1017_v8  ;;  %v82_v33 = vld [vmem:[#allocation2 + $0x120] sm:$0xff]  ;;  %v83_v35 = vld [vmem:[#allocation2 + $0x128] sm:$0xff]  ;;  %v52_v36 = vld [vmem:[#allocation2 + $0x30] sm:$0xff] }
  0x30   :  { %v84_v37 = vld [vmem:[#allocation2 + $0x130] sm:$0xff]  ;;  %v53_v38 = vld [vmem:[#allocation2 + $0x38] sm:$0xff]  ;;  %v54_v40 = vld [vmem:[#allocation2 + $0x40] sm:$0xff] }
  0x31   :  { %v85_v39 = vld [vmem:[#allocation2 + $0x138] sm:$0xff]  ;;  %v86_v41 = vld [vmem:[#allocation2 + $0x140] sm:$0xff]  ;;  %v55_v42 = vld [vmem:[#allocation2 + $0x48] sm:$0xff] }
  0x32   :  { %1020 = vmatpush3.bf16.msra.mxu0 %v1017_v8  ;;  %1051 = vmatpush3.bf16.msra.mxu1 %v1017_v8  ;;  %v87_v43 = vld [vmem:[#allocation2 + $0x148] sm:$0xff]  ;;  %v56_v44 = vld [vmem:[#allocation2 + $0x50] sm:$0xff]  ;;  %v57_v46 = vld [vmem:[#allocation2 + $0x58] sm:$0xff] }
  0x33   :  { %1022 = vmatprep.subr.bf16.mxu0 %v1021_v13  ;;  %1044 = vmatprep.subr.bf16.mxu1 %v1021_v13  ;;  %v88_v45 = vld [vmem:[#allocation2 + $0x150] sm:$0xff]  ;;  %v89_v47 = vld [vmem:[#allocation2 + $0x158] sm:$0xff]  ;;  %v58_v48 = vld [vmem:[#allocation2 + $0x60] sm:$0xff] }
  0x34   :  { %v90_v49 = vld [vmem:[#allocation2 + $0x160] sm:$0xff]  ;;  %v59_v50 = vld [vmem:[#allocation2 + $0x68] sm:$0xff]  ;;  %v60_v52 = vld [vmem:[#allocation2 + $0x70] sm:$0xff] }
  0x35   :  { %v91_v51 = vld [vmem:[#allocation2 + $0x168] sm:$0xff]  ;;  %v92_v53 = vld [vmem:[#allocation2 + $0x170] sm:$0xff]  ;;  %v61_v54 = vld [vmem:[#allocation2 + $0x78] sm:$0xff] }
  0x36   :  { %1024 = vmatpush3.bf16.msra.mxu0 %v1021_v13  ;;  %1052 = vmatpush3.bf16.msra.mxu1 %v1021_v13  ;;  %v93_v55 = vld [vmem:[#allocation2 + $0x178] sm:$0xff]  ;;  %v62_v56 = vld [vmem:[#allocation2 + $0x80] sm:$0xff]  ;;  %v63_v58 = vld [vmem:[#allocation2 + $0x88] sm:$0xff] }
  0x37   :  { %1026 = vmatprep.subr.bf16.mxu0 %v1025_v16  ;;  %1045 = vmatprep.subr.bf16.mxu1 %v1025_v16  ;;  %v94_v57 = vld [vmem:[#allocation2 + $0x180] sm:$0xff]  ;;  %v95_v59 = vld [vmem:[#allocation2 + $0x188] sm:$0xff]  ;;  %v64_v60 = vld [vmem:[#allocation2 + $0x90] sm:$0xff] }
  0x38   :  { %v96_v61 = vld [vmem:[#allocation2 + $0x190] sm:$0xff]  ;;  %v65_v62 = vld [vmem:[#allocation2 + $0x98] sm:$0xff]  ;;  %v66_v0 = vld [vmem:[#allocation2 + $0xa0] sm:$0xff] }
  0x39   :  { %v97_v63 = vld [vmem:[#allocation2 + $0x198] sm:$0xff]  ;;  %v98_v1 = vld [vmem:[#allocation2 + $0x1a0] sm:$0xff]  ;;  %v67_v2 = vld [vmem:[#allocation2 + $0xa8] sm:$0xff] }
  0x3a   :  { %1028 = vmatpush3.bf16.msra.mxu0 %v1025_v16  ;;  %1053 = vmatpush3.bf16.msra.mxu1 %v1025_v16  ;;  %v99_v3 = vld [vmem:[#allocation2 + $0x1a8] sm:$0xff]  ;;  %v68_v4 = vld [vmem:[#allocation2 + $0xb0] sm:$0xff]  ;;  %v69_v6 = vld [vmem:[#allocation2 + $0xb8] sm:$0xff] }
  0x3b   :  { %1030 = vmatprep.subr.bf16.mxu0 %v1029_v19  ;;  %1046 = vmatprep.subr.bf16.mxu1 %v1029_v19  ;;  %v100_v5 = vld [vmem:[#allocation2 + $0x1b0] sm:$0xff]  ;;  %v101_v7 = vld [vmem:[#allocation2 + $0x1b8] sm:$0xff]  ;;  %v70_v8 = vld [vmem:[#allocation2 + $0xc0] sm:$0xff] }
  0x3c   :  { %v102_v9 = vld [vmem:[#allocation2 + $0x1c0] sm:$0xff]  ;;  %v71_v10 = vld [vmem:[#allocation2 + $0xc8] sm:$0xff]  ;;  %v72_v12 = vld [vmem:[#allocation2 + $0xd0] sm:$0xff] }
  0x3d   :  { %v103_v11 = vld [vmem:[#allocation2 + $0x1c8] sm:$0xff]  ;;  %v104_v13 = vld [vmem:[#allocation2 + $0x1d0] sm:$0xff]  ;;  %v73_v14 = vld [vmem:[#allocation2 + $0xd8] sm:$0xff] }
  0x3e   :  { %1032 = vmatpush3.bf16.msra.mxu0 %v1029_v19  ;;  %1054 = vmatpush3.bf16.msra.mxu1 %v1029_v19  ;;  %v105_v15 = vld [vmem:[#allocation2 + $0x1d8] sm:$0xff]  ;;  %v74_v16 = vld [vmem:[#allocation2 + $0xe0] sm:$0xff]  ;;  %v75_v18 = vld [vmem:[#allocation2 + $0xe8] sm:$0xff] }
  0x3f   :  { %1034 = vmatprep.subr.bf16.mxu0 %v1033_v22  ;;  %1047 = vmatprep.subr.bf16.mxu1 %v1033_v22  ;;  %v106_v17 = vld [vmem:[#allocation2 + $0x1e0] sm:$0xff]  ;;  %v107_v19 = vld [vmem:[#allocation2 + $0x1e8] sm:$0xff]  ;;  %v76_v20 = vld [vmem:[#allocation2 + $0xf0] sm:$0xff] }
  0x40   :  { %v108_v21 = vld [vmem:[#allocation2 + $0x1f0] sm:$0xff]  ;;  %v109_v23 = vld [vmem:[#allocation2 + $0x1f8] sm:$0xff]  ;;  %v1197_v24 = vld [vmem:[%s1349_s2] ss:$0 sm:$0xff]  ;;  %s1138_s2 = smov [#allocation7]  }
  0x42   :  { %1036 = vmatpush3.bf16.msra.mxu0 %v1033_v22  ;;  %1055 = vmatpush3.bf16.msra.mxu1 %v1033_v22  ;;  %v77_v22 = vld [vmem:[#allocation2 + $0xf8] sm:$0xff] }
  0x43   :  { %1038 = vmatprep.subr.bf16.mxu0 %v1037_v25  ;;  %1048 = vmatprep.subr.bf16.mxu1 %v1037_v25 }
  0x46   :  { %1040 = vmatpush3.bf16.msra.mxu0 %v1037_v25  ;;  %1056 = vmatpush3.bf16.msra.mxu1 %v1037_v25 }
  0x49   :  { %914 = vmatmul.mubr.f32.vlgmr.msra.gmra.mrb[0].mxu0 %v47_v26  ;;  %962 = vmatmul.mubr.f32.vlgmr.msra.gmra.mrb[0].mxu1 %v79_v27  ;;  %v1202_v26 = vld [vmem:[%s1350_s3] ss:$0 sm:$0xff]  ;;  %s786_s3 = sshll.u32 %s1138_s2, 4  ;;  %s787_s3 = int_to_ptr.vmem [resolvable:$true] %s786_s3 }
  0x4a   :  { %916 = vmatprep.mubr.f32.mxu0 %v48_v28  ;;  %964 = vmatprep.mubr.f32.mxu1 %v80_v29  ;;  %s1106_s17 = scalar_lea.vmem %s787_s3, 8192  ;;  %p1111_p3 = scmp.lt.s32.totalorder %s787_s3, %s787_s3 }
  0x4b   :  { %p1107_p2 = scmp.ne.s32.totalorder %s787_s3, %s1106_s17  ;;  %p1112_p4 = scmp.lt.s32.totalorder %s1106_s17, %s1106_s17 }
  0x4d   :  { %917 = vmatmul.mubr.f32.gmra.mrb[2].mxu0 %v49_v30  ;;  %965 = vmatmul.mubr.f32.gmra.mrb[2].mxu1 %v81_v31  ;;  %p1113_p5 = por %p1112_p4, %p1111_p3 }
  0x4e   :  { %919 = vmatprep.mubr.f32.mxu0 %v50_v32  ;;  %967 = vmatprep.mubr.f32.mxu1 %v82_v33 }
  0x4f   :  { %p1114_p6 = pnand %p1113_p5, %p1107_p2 }
  0x51   :  { %920 = vmatmul.mubr.f32.gmra.mrb[4].mxu0 %v51_v34  ;;  %968 = vmatmul.mubr.f32.gmra.mrb[4].mxu1 %v83_v35 }
  0x52   :  { %922 = vmatprep.mubr.f32.mxu0 %v52_v36  ;;  %970 = vmatprep.mubr.f32.mxu1 %v84_v37 }
  0x55   :  { %923 = vmatmul.mubr.f32.gmra.mrb[6].mxu0 %v53_v38  ;;  %971 = vmatmul.mubr.f32.gmra.mrb[6].mxu1 %v85_v39 }
  0x56   :  { %925 = vmatprep.mubr.f32.mxu0 %v54_v40  ;;  %973 = vmatprep.mubr.f32.mxu1 %v86_v41 }
  0x59   :  { %926 = vmatmul.mubr.f32.gmra.mrb[8].mxu0 %v55_v42  ;;  %974 = vmatmul.mubr.f32.gmra.mrb[8].mxu1 %v87_v43 }
  0x5a   :  { %928 = vmatprep.mubr.f32.mxu0 %v56_v44  ;;  %976 = vmatprep.mubr.f32.mxu1 %v88_v45 }
  0x5d   :  { %929 = vmatmul.mubr.f32.gmra.mrb[10].mxu0 %v57_v46  ;;  %977 = vmatmul.mubr.f32.gmra.mrb[10].mxu1 %v89_v47 }
  0x5e   :  { %931 = vmatprep.mubr.f32.mxu0 %v58_v48  ;;  %979 = vmatprep.mubr.f32.mxu1 %v90_v49 }
  0x61   :  { %932 = vmatmul.mubr.f32.gmra.mrb[12].mxu0 %v59_v50  ;;  %980 = vmatmul.mubr.f32.gmra.mrb[12].mxu1 %v91_v51 }
  0x62   :  { %934 = vmatprep.mubr.f32.mxu0 %v60_v52  ;;  %982 = vmatprep.mubr.f32.mxu1 %v92_v53 }
  0x65   :  { %935 = vmatmul.mubr.f32.gmra.mrb[14].mxu0 %v61_v54  ;;  %983 = vmatmul.mubr.f32.gmra.mrb[14].mxu1 %v93_v55 }
  0x66   :  { %937 = vmatprep.mubr.f32.mxu0 %v62_v56  ;;  %985 = vmatprep.mubr.f32.mxu1 %v94_v57 }
  0x69   :  { %938 = vmatmul.mubr.f32.gmra.mrb[16].mxu0 %v63_v58  ;;  %986 = vmatmul.mubr.f32.gmra.mrb[16].mxu1 %v95_v59 }
  0x6a   :  { %940 = vmatprep.mubr.f32.mxu0 %v64_v60  ;;  %988 = vmatprep.mubr.f32.mxu1 %v96_v61 }
  0x6d   :  { %941 = vmatmul.mubr.f32.gmra.mrb[18].mxu0 %v65_v62  ;;  %989 = vmatmul.mubr.f32.gmra.mrb[18].mxu1 %v97_v63 }
  0x6e   :  { %943 = vmatprep.mubr.f32.mxu0 %v66_v0  ;;  %991 = vmatprep.mubr.f32.mxu1 %v98_v1 }
  0x71   :  { %944 = vmatmul.mubr.f32.gmra.mrb[20].mxu0 %v67_v2  ;;  %992 = vmatmul.mubr.f32.gmra.mrb[20].mxu1 %v99_v3 }
  0x72   :  { %946 = vmatprep.mubr.f32.mxu0 %v68_v4  ;;  %994 = vmatprep.mubr.f32.mxu1 %v100_v5 }
  0x75   :  { %947 = vmatmul.mubr.f32.gmra.mrb[22].mxu0 %v69_v6  ;;  %995 = vmatmul.mubr.f32.gmra.mrb[22].mxu1 %v101_v7 }
  0x76   :  { %949 = vmatprep.mubr.f32.mxu0 %v70_v8  ;;  %997 = vmatprep.mubr.f32.mxu1 %v102_v9 }
  0x79   :  { %950 = vmatmul.mubr.f32.gmra.mrb[24].mxu0 %v71_v10  ;;  %998 = vmatmul.mubr.f32.gmra.mrb[24].mxu1 %v103_v11 }
  0x7a   :  { %952 = vmatprep.mubr.f32.mxu0 %v72_v12  ;;  %1000 = vmatprep.mubr.f32.mxu1 %v104_v13 }
  0x7d   :  { %953 = vmatmul.mubr.f32.gmra.mrb[26].mxu0 %v73_v14  ;;  %1001 = vmatmul.mubr.f32.gmra.mrb[26].mxu1 %v105_v15 }
  0x7e   :  { %955 = vmatprep.mubr.f32.mxu0 %v74_v16  ;;  %1003 = vmatprep.mubr.f32.mxu1 %v106_v17 }
  0x81   :  { %956 = vmatmul.mubr.f32.gmra.mrb[28].mxu0 %v75_v18  ;;  %1004 = vmatmul.mubr.f32.gmra.mrb[28].mxu1 %v107_v19 }
  0x82   :  { %958 = vmatprep.mubr.f32.mxu0 %v76_v20  ;;  %1006 = vmatprep.mubr.f32.mxu1 %v108_v21 }
  0x85   :  { %959 = vmatmul.mubr.f32.gmra.mrb[30].mxu0 %v77_v22  ;;  %1007 = vmatmul.mubr.f32.gmra.mrb[30].mxu1 %v109_v23 }
 0x11c   :  { %v915_v25 = vpop.f32.mrb[0].mxu0  ;;  %v963_v27 = vpop.f32.mrb[0].mxu1 }
 0x11d   :  { %v519_v28 = vmul.f32 %v915_v25, %v1197_v24  ;;  %v551_v29 = vmul.f32 %v963_v27, %v1197_v24  ;;  %v192_v30 = vpop.f32.mrb[1].mxu0  ;;  %v352_v31 = vpop.f32.mrb[1].mxu1 }
 0x11e   :  { %v518_v32 = vmul.f32 %v1197_v24, %v192_v30  ;;  %v550_v33 = vmul.f32 %v1197_v24, %v352_v31 }
 0x11f   :  { %v590_v34 = vadd.f32 %v1202_v26, %v519_v28  ;;  %v622_v35 = vadd.f32 %v1202_v26, %v551_v29 }
 0x120   :  { %v589_v36 = vadd.f32 %v1202_v26, %v518_v32  ;;  %v621_v37 = vadd.f32 %v1202_v26, %v550_v33  ;;  %v918_v38 = vpop.f32.mrb[2].mxu0  ;;  %v966_v39 = vpop.f32.mrb[2].mxu1 }
 0x121   :  { %v654_v40 = vmax.f32 %v590_v34, 0.0  ;;  %v686_v41 = vmax.f32 %v622_v35, 0.0  ;;  %v521_v42 = vmul.f32 %v918_v38, %v1197_v24  ;;  %v553_v43 = vmul.f32 %v966_v39, %v1197_v24  ;;  %v202_v44 = vpop.f32.mrb[3].mxu0  ;;  %v362_v45 = vpop.f32.mrb[3].mxu1 }
 0x122   :  { %v653_v46 = vmax.f32 %v589_v36, 0.0  ;;  %v685_v47 = vmax.f32 %v621_v37, 0.0  ;;  %v520_v48 = vmul.f32 %v1197_v24, %v202_v44  ;;  %v552_v49 = vmul.f32 %v1197_v24, %v362_v45 }
 0x123   :  { %718 = vst [vmem:[#allocation7 + $0x8] sm:$0xff] %v654_v40  ;;  %750 = vst [vmem:[#allocation7 + $0x108] sm:$0xff] %v686_v41  ;;  %v592_v50 = vadd.f32 %v1202_v26, %v521_v42  ;;  %v624_v51 = vadd.f32 %v1202_v26, %v553_v43 }
 0x124   :  { %717 = vst [vmem:[#allocation7] sm:$0xff] %v653_v46  ;;  %749 = vst [vmem:[#allocation7 + $0x100] sm:$0xff] %v685_v47  ;;  %v591_v52 = vadd.f32 %v1202_v26, %v520_v48  ;;  %v623_v53 = vadd.f32 %v1202_v26, %v552_v49  ;;  %v921_v54 = vpop.f32.mrb[4].mxu0  ;;  %v969_v55 = vpop.f32.mrb[4].mxu1 }
 0x125   :  { %v656_v56 = vmax.f32 %v592_v50, 0.0  ;;  %v688_v57 = vmax.f32 %v624_v51, 0.0  ;;  %v523_v58 = vmul.f32 %v921_v54, %v1197_v24  ;;  %v555_v59 = vmul.f32 %v969_v55, %v1197_v24  ;;  %v212_v60 = vpop.f32.mrb[5].mxu0  ;;  %v372_v61 = vpop.f32.mrb[5].mxu1 }
 0x126   :  { %v655_v62 = vmax.f32 %v591_v52, 0.0  ;;  %v687_v63 = vmax.f32 %v623_v53, 0.0  ;;  %v522_v0 = vmul.f32 %v1197_v24, %v212_v60  ;;  %v554_v1 = vmul.f32 %v1197_v24, %v372_v61 }
 0x127   :  { %720 = vst [vmem:[#allocation7 + $0x18] sm:$0xff] %v656_v56  ;;  %752 = vst [vmem:[#allocation7 + $0x118] sm:$0xff] %v688_v57  ;;  %v594_v2 = vadd.f32 %v1202_v26, %v523_v58  ;;  %v626_v3 = vadd.f32 %v1202_v26, %v555_v59 }
 0x128   :  { %719 = vst [vmem:[#allocation7 + $0x10] sm:$0xff] %v655_v62  ;;  %751 = vst [vmem:[#allocation7 + $0x110] sm:$0xff] %v687_v63  ;;  %v593_v4 = vadd.f32 %v1202_v26, %v522_v0  ;;  %v625_v5 = vadd.f32 %v1202_v26, %v554_v1  ;;  %v924_v6 = vpop.f32.mrb[6].mxu0  ;;  %v972_v7 = vpop.f32.mrb[6].mxu1 }
 0x129   :  { %v658_v8 = vmax.f32 %v594_v2, 0.0  ;;  %v690_v9 = vmax.f32 %v626_v3, 0.0  ;;  %v525_v10 = vmul.f32 %v924_v6, %v1197_v24  ;;  %v557_v11 = vmul.f32 %v972_v7, %v1197_v24  ;;  %v222_v12 = vpop.f32.mrb[7].mxu0  ;;  %v382_v13 = vpop.f32.mrb[7].mxu1 }
 0x12a   :  { %v657_v14 = vmax.f32 %v593_v4, 0.0  ;;  %v689_v15 = vmax.f32 %v625_v5, 0.0  ;;  %v524_v16 = vmul.f32 %v1197_v24, %v222_v12  ;;  %v556_v17 = vmul.f32 %v1197_v24, %v382_v13 }
 0x12b   :  { %722 = vst [vmem:[#allocation7 + $0x28] sm:$0xff] %v658_v8  ;;  %754 = vst [vmem:[#allocation7 + $0x128] sm:$0xff] %v690_v9  ;;  %v596_v18 = vadd.f32 %v1202_v26, %v525_v10  ;;  %v628_v19 = vadd.f32 %v1202_v26, %v557_v11 }
 0x12c   :  { %721 = vst [vmem:[#allocation7 + $0x20] sm:$0xff] %v657_v14  ;;  %753 = vst [vmem:[#allocation7 + $0x120] sm:$0xff] %v689_v15  ;;  %v595_v20 = vadd.f32 %v1202_v26, %v524_v16  ;;  %v627_v21 = vadd.f32 %v1202_v26, %v556_v17  ;;  %v927_v22 = vpop.f32.mrb[8].mxu0  ;;  %v975_v23 = vpop.f32.mrb[8].mxu1 }
 0x12d   :  { %v660_v25 = vmax.f32 %v596_v18, 0.0  ;;  %v692_v27 = vmax.f32 %v628_v19, 0.0  ;;  %v527_v28 = vmul.f32 %v927_v22, %v1197_v24  ;;  %v559_v29 = vmul.f32 %v975_v23, %v1197_v24  ;;  %v232_v30 = vpop.f32.mrb[9].mxu0  ;;  %v392_v31 = vpop.f32.mrb[9].mxu1 }
 0x12e   :  { %v659_v32 = vmax.f32 %v595_v20, 0.0  ;;  %v691_v33 = vmax.f32 %v627_v21, 0.0  ;;  %v526_v34 = vmul.f32 %v1197_v24, %v232_v30  ;;  %v558_v35 = vmul.f32 %v1197_v24, %v392_v31 }
 0x12f   :  { %724 = vst [vmem:[#allocation7 + $0x38] sm:$0xff] %v660_v25  ;;  %756 = vst [vmem:[#allocation7 + $0x138] sm:$0xff] %v692_v27  ;;  %v598_v36 = vadd.f32 %v1202_v26, %v527_v28  ;;  %v630_v37 = vadd.f32 %v1202_v26, %v559_v29 }
 0x130   :  { %723 = vst [vmem:[#allocation7 + $0x30] sm:$0xff] %v659_v32  ;;  %755 = vst [vmem:[#allocation7 + $0x130] sm:$0xff] %v691_v33  ;;  %v597_v38 = vadd.f32 %v1202_v26, %v526_v34  ;;  %v629_v39 = vadd.f32 %v1202_v26, %v558_v35  ;;  %v930_v40 = vpop.f32.mrb[10].mxu0  ;;  %v978_v41 = vpop.f32.mrb[10].mxu1 }
 0x131   :  { %v662_v42 = vmax.f32 %v598_v36, 0.0  ;;  %v694_v43 = vmax.f32 %v630_v37, 0.0  ;;  %v529_v44 = vmul.f32 %v930_v40, %v1197_v24  ;;  %v561_v45 = vmul.f32 %v978_v41, %v1197_v24  ;;  %v242_v46 = vpop.f32.mrb[11].mxu0  ;;  %v402_v47 = vpop.f32.mrb[11].mxu1 }
 0x132   :  { %v661_v48 = vmax.f32 %v597_v38, 0.0  ;;  %v693_v49 = vmax.f32 %v629_v39, 0.0  ;;  %v528_v50 = vmul.f32 %v1197_v24, %v242_v46  ;;  %v560_v51 = vmul.f32 %v1197_v24, %v402_v47 }
 0x133   :  { %726 = vst [vmem:[#allocation7 + $0x48] sm:$0xff] %v662_v42  ;;  %758 = vst [vmem:[#allocation7 + $0x148] sm:$0xff] %v694_v43  ;;  %v600_v52 = vadd.f32 %v1202_v26, %v529_v44  ;;  %v632_v53 = vadd.f32 %v1202_v26, %v561_v45 }
 0x134   :  { %725 = vst [vmem:[#allocation7 + $0x40] sm:$0xff] %v661_v48  ;;  %757 = vst [vmem:[#allocation7 + $0x140] sm:$0xff] %v693_v49  ;;  %v599_v54 = vadd.f32 %v1202_v26, %v528_v50  ;;  %v631_v55 = vadd.f32 %v1202_v26, %v560_v51  ;;  %v933_v56 = vpop.f32.mrb[12].mxu0  ;;  %v981_v57 = vpop.f32.mrb[12].mxu1 }
 0x135   :  { %v664_v58 = vmax.f32 %v600_v52, 0.0  ;;  %v696_v59 = vmax.f32 %v632_v53, 0.0  ;;  %v531_v60 = vmul.f32 %v933_v56, %v1197_v24  ;;  %v563_v61 = vmul.f32 %v981_v57, %v1197_v24  ;;  %v252_v62 = vpop.f32.mrb[13].mxu0  ;;  %v412_v63 = vpop.f32.mrb[13].mxu1 }
 0x136   :  { %v663_v0 = vmax.f32 %v599_v54, 0.0  ;;  %v695_v1 = vmax.f32 %v631_v55, 0.0  ;;  %v530_v2 = vmul.f32 %v1197_v24, %v252_v62  ;;  %v562_v3 = vmul.f32 %v1197_v24, %v412_v63 }
 0x137   :  { %728 = vst [vmem:[#allocation7 + $0x58] sm:$0xff] %v664_v58  ;;  %760 = vst [vmem:[#allocation7 + $0x158] sm:$0xff] %v696_v59  ;;  %v602_v4 = vadd.f32 %v1202_v26, %v531_v60  ;;  %v634_v5 = vadd.f32 %v1202_v26, %v563_v61 }
 0x138   :  { %727 = vst [vmem:[#allocation7 + $0x50] sm:$0xff] %v663_v0  ;;  %759 = vst [vmem:[#allocation7 + $0x150] sm:$0xff] %v695_v1  ;;  %v601_v6 = vadd.f32 %v1202_v26, %v530_v2  ;;  %v633_v7 = vadd.f32 %v1202_v26, %v562_v3  ;;  %v936_v8 = vpop.f32.mrb[14].mxu0  ;;  %v984_v9 = vpop.f32.mrb[14].mxu1 }
 0x139   :  { %v666_v10 = vmax.f32 %v602_v4, 0.0  ;;  %v698_v11 = vmax.f32 %v634_v5, 0.0  ;;  %v533_v12 = vmul.f32 %v936_v8, %v1197_v24  ;;  %v565_v13 = vmul.f32 %v984_v9, %v1197_v24  ;;  %v262_v14 = vpop.f32.mrb[15].mxu0  ;;  %v422_v15 = vpop.f32.mrb[15].mxu1 }
 0x13a   :  { %v665_v16 = vmax.f32 %v601_v6, 0.0  ;;  %v697_v17 = vmax.f32 %v633_v7, 0.0  ;;  %v532_v18 = vmul.f32 %v1197_v24, %v262_v14  ;;  %v564_v19 = vmul.f32 %v1197_v24, %v422_v15 }
 0x13b   :  { %730 = vst [vmem:[#allocation7 + $0x68] sm:$0xff] %v666_v10  ;;  %762 = vst [vmem:[#allocation7 + $0x168] sm:$0xff] %v698_v11  ;;  %v604_v20 = vadd.f32 %v1202_v26, %v533_v12  ;;  %v636_v21 = vadd.f32 %v1202_v26, %v565_v13 }
 0x13c   :  { %729 = vst [vmem:[#allocation7 + $0x60] sm:$0xff] %v665_v16  ;;  %761 = vst [vmem:[#allocation7 + $0x160] sm:$0xff] %v697_v17  ;;  %v603_v22 = vadd.f32 %v1202_v26, %v532_v18  ;;  %v635_v23 = vadd.f32 %v1202_v26, %v564_v19  ;;  %v939_v25 = vpop.f32.mrb[16].mxu0  ;;  %v987_v27 = vpop.f32.mrb[16].mxu1 }
 0x13d   :  { %v668_v28 = vmax.f32 %v604_v20, 0.0  ;;  %v700_v29 = vmax.f32 %v636_v21, 0.0  ;;  %v535_v30 = vmul.f32 %v939_v25, %v1197_v24  ;;  %v567_v31 = vmul.f32 %v987_v27, %v1197_v24  ;;  %v272_v32 = vpop.f32.mrb[17].mxu0  ;;  %v432_v33 = vpop.f32.mrb[17].mxu1 }
 0x13e   :  { %v667_v34 = vmax.f32 %v603_v22, 0.0  ;;  %v699_v35 = vmax.f32 %v635_v23, 0.0  ;;  %v534_v36 = vmul.f32 %v1197_v24, %v272_v32  ;;  %v566_v37 = vmul.f32 %v1197_v24, %v432_v33 }
 0x13f   :  { %732 = vst [vmem:[#allocation7 + $0x78] sm:$0xff] %v668_v28  ;;  %764 = vst [vmem:[#allocation7 + $0x178] sm:$0xff] %v700_v29  ;;  %v606_v38 = vadd.f32 %v1202_v26, %v535_v30  ;;  %v638_v39 = vadd.f32 %v1202_v26, %v567_v31 }
 0x140   :  { %731 = vst [vmem:[#allocation7 + $0x70] sm:$0xff] %v667_v34  ;;  %763 = vst [vmem:[#allocation7 + $0x170] sm:$0xff] %v699_v35  ;;  %v605_v40 = vadd.f32 %v1202_v26, %v534_v36  ;;  %v637_v41 = vadd.f32 %v1202_v26, %v566_v37  ;;  %v942_v42 = vpop.f32.mrb[18].mxu0  ;;  %v990_v43 = vpop.f32.mrb[18].mxu1 }
 0x141   :  { %v670_v44 = vmax.f32 %v606_v38, 0.0  ;;  %v702_v45 = vmax.f32 %v638_v39, 0.0  ;;  %v537_v46 = vmul.f32 %v942_v42, %v1197_v24  ;;  %v569_v47 = vmul.f32 %v990_v43, %v1197_v24  ;;  %v282_v48 = vpop.f32.mrb[19].mxu0  ;;  %v442_v49 = vpop.f32.mrb[19].mxu1 }
 0x142   :  { %v669_v50 = vmax.f32 %v605_v40, 0.0  ;;  %v701_v51 = vmax.f32 %v637_v41, 0.0  ;;  %v536_v52 = vmul.f32 %v1197_v24, %v282_v48  ;;  %v568_v53 = vmul.f32 %v1197_v24, %v442_v49 }
 0x143   :  { %734 = vst [vmem:[#allocation7 + $0x88] sm:$0xff] %v670_v44  ;;  %766 = vst [vmem:[#allocation7 + $0x188] sm:$0xff] %v702_v45  ;;  %v608_v54 = vadd.f32 %v1202_v26, %v537_v46  ;;  %v640_v55 = vadd.f32 %v1202_v26, %v569_v47 }
 0x144   :  { %733 = vst [vmem:[#allocation7 + $0x80] sm:$0xff] %v669_v50  ;;  %765 = vst [vmem:[#allocation7 + $0x180] sm:$0xff] %v701_v51  ;;  %v607_v56 = vadd.f32 %v1202_v26, %v536_v52  ;;  %v639_v57 = vadd.f32 %v1202_v26, %v568_v53  ;;  %v945_v58 = vpop.f32.mrb[20].mxu0  ;;  %v993_v59 = vpop.f32.mrb[20].mxu1 }
 0x145   :  { %v672_v60 = vmax.f32 %v608_v54, 0.0  ;;  %v704_v61 = vmax.f32 %v640_v55, 0.0  ;;  %v539_v62 = vmul.f32 %v945_v58, %v1197_v24  ;;  %v571_v63 = vmul.f32 %v993_v59, %v1197_v24  ;;  %v292_v0 = vpop.f32.mrb[21].mxu0  ;;  %v452_v1 = vpop.f32.mrb[21].mxu1 }
 0x146   :  { %v671_v2 = vmax.f32 %v607_v56, 0.0  ;;  %v703_v3 = vmax.f32 %v639_v57, 0.0  ;;  %v538_v4 = vmul.f32 %v1197_v24, %v292_v0  ;;  %v570_v5 = vmul.f32 %v1197_v24, %v452_v1 }
 0x147   :  { %736 = vst [vmem:[#allocation7 + $0x98] sm:$0xff] %v672_v60  ;;  %768 = vst [vmem:[#allocation7 + $0x198] sm:$0xff] %v704_v61  ;;  %v610_v6 = vadd.f32 %v1202_v26, %v539_v62  ;;  %v642_v7 = vadd.f32 %v1202_v26, %v571_v63 }
 0x148   :  { %735 = vst [vmem:[#allocation7 + $0x90] sm:$0xff] %v671_v2  ;;  %767 = vst [vmem:[#allocation7 + $0x190] sm:$0xff] %v703_v3  ;;  %v609_v8 = vadd.f32 %v1202_v26, %v538_v4  ;;  %v641_v9 = vadd.f32 %v1202_v26, %v570_v5  ;;  %v948_v10 = vpop.f32.mrb[22].mxu0  ;;  %v996_v11 = vpop.f32.mrb[22].mxu1 }
 0x149   :  { %v674_v12 = vmax.f32 %v610_v6, 0.0  ;;  %v706_v13 = vmax.f32 %v642_v7, 0.0  ;;  %v541_v14 = vmul.f32 %v948_v10, %v1197_v24  ;;  %v573_v15 = vmul.f32 %v996_v11, %v1197_v24  ;;  %v302_v16 = vpop.f32.mrb[23].mxu0  ;;  %v462_v17 = vpop.f32.mrb[23].mxu1 }
 0x14a   :  { %v673_v18 = vmax.f32 %v609_v8, 0.0  ;;  %v705_v19 = vmax.f32 %v641_v9, 0.0  ;;  %v540_v20 = vmul.f32 %v1197_v24, %v302_v16  ;;  %v572_v21 = vmul.f32 %v1197_v24, %v462_v17 }
 0x14b   :  { %738 = vst [vmem:[#allocation7 + $0xa8] sm:$0xff] %v674_v12  ;;  %770 = vst [vmem:[#allocation7 + $0x1a8] sm:$0xff] %v706_v13  ;;  %v612_v22 = vadd.f32 %v1202_v26, %v541_v14  ;;  %v644_v23 = vadd.f32 %v1202_v26, %v573_v15 }
 0x14c   :  { %737 = vst [vmem:[#allocation7 + $0xa0] sm:$0xff] %v673_v18  ;;  %769 = vst [vmem:[#allocation7 + $0x1a0] sm:$0xff] %v705_v19  ;;  %v611_v25 = vadd.f32 %v1202_v26, %v540_v20  ;;  %v643_v27 = vadd.f32 %v1202_v26, %v572_v21  ;;  %v951_v28 = vpop.f32.mrb[24].mxu0  ;;  %v999_v29 = vpop.f32.mrb[24].mxu1 }
 0x14d   :  { %v676_v30 = vmax.f32 %v612_v22, 0.0  ;;  %v708_v31 = vmax.f32 %v644_v23, 0.0  ;;  %v543_v32 = vmul.f32 %v951_v28, %v1197_v24  ;;  %v575_v33 = vmul.f32 %v999_v29, %v1197_v24  ;;  %v312_v34 = vpop.f32.mrb[25].mxu0  ;;  %v472_v35 = vpop.f32.mrb[25].mxu1 }
 0x14e   :  { %v675_v36 = vmax.f32 %v611_v25, 0.0  ;;  %v707_v37 = vmax.f32 %v643_v27, 0.0  ;;  %v542_v38 = vmul.f32 %v1197_v24, %v312_v34  ;;  %v574_v39 = vmul.f32 %v1197_v24, %v472_v35 }
 0x14f   :  { %740 = vst [vmem:[#allocation7 + $0xb8] sm:$0xff] %v676_v30  ;;  %772 = vst [vmem:[#allocation7 + $0x1b8] sm:$0xff] %v708_v31  ;;  %v614_v40 = vadd.f32 %v1202_v26, %v543_v32  ;;  %v646_v41 = vadd.f32 %v1202_v26, %v575_v33 }
 0x150   :  { %739 = vst [vmem:[#allocation7 + $0xb0] sm:$0xff] %v675_v36  ;;  %771 = vst [vmem:[#allocation7 + $0x1b0] sm:$0xff] %v707_v37  ;;  %v613_v42 = vadd.f32 %v1202_v26, %v542_v38  ;;  %v645_v43 = vadd.f32 %v1202_v26, %v574_v39  ;;  %v954_v44 = vpop.f32.mrb[26].mxu0  ;;  %v1002_v45 = vpop.f32.mrb[26].mxu1 }
 0x151   :  { %v678_v46 = vmax.f32 %v614_v40, 0.0  ;;  %v710_v47 = vmax.f32 %v646_v41, 0.0  ;;  %v545_v48 = vmul.f32 %v954_v44, %v1197_v24  ;;  %v577_v49 = vmul.f32 %v1002_v45, %v1197_v24  ;;  %v322_v50 = vpop.f32.mrb[27].mxu0  ;;  %v482_v51 = vpop.f32.mrb[27].mxu1 }
 0x152   :  { %v677_v52 = vmax.f32 %v613_v42, 0.0  ;;  %v709_v53 = vmax.f32 %v645_v43, 0.0  ;;  %v544_v54 = vmul.f32 %v1197_v24, %v322_v50  ;;  %v576_v55 = vmul.f32 %v1197_v24, %v482_v51 }
 0x153   :  { %742 = vst [vmem:[#allocation7 + $0xc8] sm:$0xff] %v678_v46  ;;  %774 = vst [vmem:[#allocation7 + $0x1c8] sm:$0xff] %v710_v47  ;;  %v616_v56 = vadd.f32 %v1202_v26, %v545_v48  ;;  %v648_v57 = vadd.f32 %v1202_v26, %v577_v49 }
 0x154   :  { %741 = vst [vmem:[#allocation7 + $0xc0] sm:$0xff] %v677_v52  ;;  %773 = vst [vmem:[#allocation7 + $0x1c0] sm:$0xff] %v709_v53  ;;  %v615_v58 = vadd.f32 %v1202_v26, %v544_v54  ;;  %v647_v59 = vadd.f32 %v1202_v26, %v576_v55  ;;  %v957_v60 = vpop.f32.mrb[28].mxu0  ;;  %v1005_v61 = vpop.f32.mrb[28].mxu1 }
 0x155   :  { %v680_v62 = vmax.f32 %v616_v56, 0.0  ;;  %v712_v63 = vmax.f32 %v648_v57, 0.0  ;;  %v547_v0 = vmul.f32 %v957_v60, %v1197_v24  ;;  %v579_v1 = vmul.f32 %v1005_v61, %v1197_v24  ;;  %v332_v2 = vpop.f32.mrb[29].mxu0  ;;  %v492_v3 = vpop.f32.mrb[29].mxu1 }
 0x156   :  { %v679_v4 = vmax.f32 %v615_v58, 0.0  ;;  %v711_v5 = vmax.f32 %v647_v59, 0.0  ;;  %v546_v6 = vmul.f32 %v1197_v24, %v332_v2  ;;  %v578_v7 = vmul.f32 %v1197_v24, %v492_v3 }
 0x157   :  { %744 = vst [vmem:[#allocation7 + $0xd8] sm:$0xff] %v680_v62  ;;  %776 = vst [vmem:[#allocation7 + $0x1d8] sm:$0xff] %v712_v63  ;;  %v618_v8 = vadd.f32 %v1202_v26, %v547_v0  ;;  %v650_v9 = vadd.f32 %v1202_v26, %v579_v1 }
 0x158   :  { %743 = vst [vmem:[#allocation7 + $0xd0] sm:$0xff] %v679_v4  ;;  %775 = vst [vmem:[#allocation7 + $0x1d0] sm:$0xff] %v711_v5  ;;  %v617_v10 = vadd.f32 %v1202_v26, %v546_v6  ;;  %v649_v11 = vadd.f32 %v1202_v26, %v578_v7  ;;  %v960_v12 = vpop.f32.mrb[30].mxu0  ;;  %v1008_v13 = vpop.f32.mrb[30].mxu1 }
 0x159   :  { %v682_v14 = vmax.f32 %v618_v8, 0.0  ;;  %v714_v15 = vmax.f32 %v650_v9, 0.0  ;;  %v549_v16 = vmul.f32 %v960_v12, %v1197_v24  ;;  %v581_v17 = vmul.f32 %v1008_v13, %v1197_v24  ;;  %v342_v18 = vpop.f32.mrb[31].mxu0  ;;  %v502_v19 = vpop.f32.mrb[31].mxu1 }
 0x15a   :  { %v681_v20 = vmax.f32 %v617_v10, 0.0  ;;  %v713_v21 = vmax.f32 %v649_v11, 0.0  ;;  %v548_v22 = vmul.f32 %v1197_v24, %v342_v18  ;;  %v580_v23 = vmul.f32 %v1197_v24, %v502_v19 }
 0x15b   :  { %746 = vst [vmem:[#allocation7 + $0xe8] sm:$0xff] %v682_v14  ;;  %778 = vst [vmem:[#allocation7 + $0x1e8] sm:$0xff] %v714_v15  ;;  %v620_v25 = vadd.f32 %v1202_v26, %v549_v16  ;;  %v652_v27 = vadd.f32 %v1202_v26, %v581_v17 }
 0x15c   :  { %745 = vst [vmem:[#allocation7 + $0xe0] sm:$0xff] %v681_v20  ;;  %777 = vst [vmem:[#allocation7 + $0x1e0] sm:$0xff] %v713_v21  ;;  %v619_v28 = vadd.f32 %v1202_v26, %v548_v22  ;;  %v651_v29 = vadd.f32 %v1202_v26, %v580_v23 }
 0x15d   :  { %v684_v30 = vmax.f32 %v620_v25, 0.0  ;;  %v716_v31 = vmax.f32 %v652_v27, 0.0 }
 0x15e   :  { %v683_v32 = vmax.f32 %v619_v28, 0.0  ;;  %v715_v33 = vmax.f32 %v651_v29, 0.0 }
 0x15f   :  { %748 = vst [vmem:[#allocation7 + $0xf8] sm:$0xff] %v684_v30  ;;  %780 = vst [vmem:[#allocation7 + $0x1f8] sm:$0xff] %v716_v31 }
 0x160   :  { %747 = vst [vmem:[#allocation7 + $0xf0] sm:$0xff] %v683_v32  ;;  %779 = vst [vmem:[#allocation7 + $0x1f0] sm:$0xff] %v715_v33 }
 0x161   :  { %1117 = shalt.err (!%p1114_p6)
}
 0x162   :  { %s1118_s20 = scalar_lea.hbm %s1351_s4, 8192 }
 0x163   :  { %p1119_p7 = scmp.ne.s32.totalorder %s1351_s4, %s1118_s20  ;;  %p1122_p8 = scmp.lt.u32.totalorder %s1118_s20, %s1351_s4 }
 0x165   :  { %p1124_p9 = pnand %p1122_p8, %p1119_p7 }
 0x167   :  { %1127 = shalt.err (!%p1124_p9)
}
 0x168   :  { %792 = dma.vmem_to_hbm [thread:$0]  %s787_s3, 8192, %s1351_s4, [#allocation4], %s1135_s25, %s1135_s25, %s1136_s26  }
 0x169   :  { %1132 = dma.done.wait [#allocation4], 8192  }
 0x16a   :  { %1133 = vsyncadd [#allocation4], 4294959104 }
 0x16b   :  { %796 = vsyncpa [#allocation3], 1 }
 0x16c   :  { %797 = vsyncpa [#allocation6], 1 }
 0x16d   :  { %798 = vsyncpa [#allocation4], 1 }

</bundles_post_ra>
